<compile_context>
chip_gen: v5e
topology: v5e:2x2
jax: 0.10.0
libtpu: 0.0.40
codegen_flags: <defaults>
</compile_context>

<pallas_src>
import jax
import jax.numpy as jnp
from jax.experimental import pallas as pl
from jax.experimental.pallas import tpu as pltpu

_LANE = 128
_SUBLANE = 8


def _round_up(n: int, m: int) -> int:
    return ((n + m - 1) // m) * m


def _dqn_kernel(x_ref, w0_ref, b0_ref, w1_ref, b1_ref, w2_ref, b2_ref, o_ref):
    """One batch tile of the 3-layer MLP. Weights/activations may be bf16; the
    accumulation, bias add, ReLU and output are f32."""
    cdt = w0_ref.dtype  # MXU compute dtype (f32 or bf16)

    # obs_embed: Linear(obs_dim -> inner_embed)
    h0 = jnp.dot(x_ref[...], w0_ref[...],
                 preferred_element_type=jnp.float32) + b0_ref[...]
    # ffn layer 1: Linear(inner -> inner) + ReLU
    h1 = jnp.dot(h0.astype(cdt), w1_ref[...],
                 preferred_element_type=jnp.float32) + b1_ref[...]
    h1 = jnp.maximum(h1, 0.0)
    # ffn layer 2: Linear(inner -> num_actions)
    out = jnp.dot(h1.astype(cdt), w2_ref[...],
                  preferred_element_type=jnp.float32) + b2_ref[...]
    o_ref[...] = out.astype(o_ref.dtype)


def dqn_forward(x, params, *, block_batch: int = 256,
                compute_dtype=jnp.float32):
    """x: [batch, obs_dim] float32. params: dict of transposed weights/biases
    (logical, unpadded shapes). Returns [batch, num_actions] float32."""
    w0, b0 = params["w0"], params["b0"]   # [obs_dim, inner], [1, inner]
    w1, b1 = params["w1"], params["b1"]   # [inner, inner],   [1, inner]
    w2, b2 = params["w2"], params["b2"]   # [inner, actions], [1, actions]

    batch, obs_dim = x.shape
    inner = w0.shape[1]
    num_actions = w2.shape[1]

    # --- pad every feature dim to a lane multiple (lane-dense loads/stores, full
    # --- MXU tiles); pad batch to a sublane-aligned tile count.
    obs_p = _round_up(obs_dim, _LANE)
    inner_p = _round_up(inner, _LANE)
    act_p = _round_up(num_actions, _LANE)

    tb = min(block_batch, _round_up(batch, _SUBLANE))
    batch_p = _round_up(batch, tb)
    grid = (batch_p // tb,)

    xp = jnp.pad(x, ((0, batch_p - batch), (0, obs_p - obs_dim))).astype(compute_dtype)
    w0p = jnp.pad(w0, ((0, obs_p - obs_dim), (0, inner_p - inner))).astype(compute_dtype)
    w1p = jnp.pad(w1, ((0, inner_p - inner), (0, inner_p - inner))).astype(compute_dtype)
    w2p = jnp.pad(w2, ((0, inner_p - inner), (0, act_p - num_actions))).astype(compute_dtype)
    # Biases stay f32 (epilogue is f32 on all generations, incl. v5e).
    b0p = jnp.pad(b0, ((0, 0), (0, inner_p - inner))).astype(jnp.float32)
    b1p = jnp.pad(b1, ((0, 0), (0, inner_p - inner))).astype(jnp.float32)
    b2p = jnp.pad(b2, ((0, 0), (0, act_p - num_actions))).astype(jnp.float32)

    out_p = pl.pallas_call(
        _dqn_kernel,
        out_shape=jax.ShapeDtypeStruct((batch_p, act_p), jnp.float32),
        grid_spec=pl.GridSpec(
            grid=grid,
            in_specs=[
                # activations: walk the batch axis
                pl.BlockSpec((tb, obs_p), lambda i: (i, 0)),
                # weights / biases: constant index maps -> stay VMEM-resident
                pl.BlockSpec((obs_p, inner_p), lambda i: (0, 0)),
                pl.BlockSpec((1, inner_p), lambda i: (0, 0)),
                pl.BlockSpec((inner_p, inner_p), lambda i: (0, 0)),
                pl.BlockSpec((1, inner_p), lambda i: (0, 0)),
                pl.BlockSpec((inner_p, act_p), lambda i: (0, 0)),
                pl.BlockSpec((1, act_p), lambda i: (0, 0)),
            ],
            out_specs=pl.BlockSpec((tb, act_p), lambda i: (i, 0)),
        ),
        compiler_params=pltpu.CompilerParams(
            dimension_semantics=("parallel",)),
    )(xp, w0p, b0p, w1p, b1p, w2p, b2p)

    # slice the lane/batch padding off outside the kernel
    return out_p[:batch, :num_actions]


def init_dqn_params(key, obs_dim, inner_embed, num_actions):
    """Deterministic init matching module._init_weights: weights ~ N(0, 0.02), bias = 0.
    Weights are stored pre-transposed as [in, out] (logical, unpadded shapes)."""
    k0, k1, k2 = jax.random.split(key, 3)
    std = 0.02
    return {
        "w0": std * jax.random.normal(k0, (obs_dim, inner_embed), jnp.float32),
        "b0": jnp.zeros((1, inner_embed), jnp.float32),
        "w1": std * jax.random.normal(k1, (inner_embed, inner_embed), jnp.float32),
        "b1": jnp.zeros((1, inner_embed), jnp.float32),
        "w2": std * jax.random.normal(k2, (inner_embed, num_actions), jnp.float32),
        "b2": jnp.zeros((1, num_actions), jnp.float32),
    }


def _reference(x, p):
    h0 = x @ p["w0"] + p["b0"]
    h1 = jnp.maximum(h0 @ p["w1"] + p["b1"], 0.0)
    return h1 @ p["w2"] + p["b2"]


if __name__ == "__main__":
    # Shapes consistent with DQN(input_shape=16, num_actions=4,
    #                            inner_embed_size=32, is_discrete_env=False)
    obs_dim, inner_embed, num_actions = 16, 32, 4

    key = jax.random.PRNGKey(0)
    kx, kp, kx2 = jax.random.split(key, 3)
    params = init_dqn_params(kp, obs_dim, inner_embed, num_actions)

    # ---- primary check: small batch, f32 compute (tight tolerance) ----
    batch = 8
    x = jax.random.normal(kx, (batch, obs_dim), jnp.float32)
    out = jax.block_until_ready(dqn_forward(x, params))
    ref = _reference(x, params)
    assert out.shape == (batch, num_actions)
    assert jnp.allclose(out, ref, atol=1e-5, rtol=1e-5), "f32 mismatch vs reference"

    # ---- secondary check: tiled batch (grid of 2), bf16 MXU path ----
    batch2 = 512
    x2 = jax.random.normal(kx2, (batch2, obs_dim), jnp.float32)
    out2 = jax.block_until_ready(
        dqn_forward(x2, params, block_batch=256, compute_dtype=jnp.bfloat16))
    ref2 = _reference(x2, params)
    assert out2.shape == (batch2, num_actions)
    assert jnp.allclose(out2, ref2, atol=1e-2, rtol=1e-2), "bf16 mismatch vs reference"

    print("KERNEL_OK")
</pallas_src>

<mosaic_0001>
module attributes {stable_mosaic.version = 11 : i64} {
  func.func @_dqn_kernel(%arg0: i32, %arg1: memref<8x128xf32, #tpu.memory_space<vmem>>, %arg2: memref<128x128xf32, #tpu.memory_space<vmem>>, %arg3: memref<1x128xf32, #tpu.memory_space<vmem>>, %arg4: memref<128x128xf32, #tpu.memory_space<vmem>>, %arg5: memref<1x128xf32, #tpu.memory_space<vmem>>, %arg6: memref<128x128xf32, #tpu.memory_space<vmem>>, %arg7: memref<1x128xf32, #tpu.memory_space<vmem>>, %arg8: memref<8x128xf32, #tpu.memory_space<vmem>>) attributes {dimension_semantics = [#tpu.dimension_semantics<parallel>], iteration_bounds = array<i64: 1>, scalar_prefetch = 0 : i64, scratch_operands = 0 : i64, tpu.core_type = #tpu.core_type<tc>, window_params = [{transform_indices = @transform_0, window_bounds = array<i64: 8, 128>}, {pipeline_mode = #tpu.pipeline_mode<synchronous>, transform_indices = @transform_1, window_bounds = array<i64: 128, 128>}, {pipeline_mode = #tpu.pipeline_mode<synchronous>, transform_indices = @transform_2, window_bounds = array<i64: 1, 128>}, {pipeline_mode = #tpu.pipeline_mode<synchronous>, transform_indices = @transform_3, window_bounds = array<i64: 128, 128>}, {pipeline_mode = #tpu.pipeline_mode<synchronous>, transform_indices = @transform_4, window_bounds = array<i64: 1, 128>}, {pipeline_mode = #tpu.pipeline_mode<synchronous>, transform_indices = @transform_5, window_bounds = array<i64: 128, 128>}, {pipeline_mode = #tpu.pipeline_mode<synchronous>, transform_indices = @transform_6, window_bounds = array<i64: 1, 128>}, {transform_indices = @transform_7, window_bounds = array<i64: 8, 128>}]} {
    %c0 = arith.constant 0 : index
    %c0_0 = arith.constant 0 : index
    %0 = vector.load %arg1[%c0, %c0_0] : memref<8x128xf32, #tpu.memory_space<vmem>>, vector<8x128xf32>
    %c0_1 = arith.constant 0 : index
    %c0_2 = arith.constant 0 : index
    %1 = vector.load %arg2[%c0_1, %c0_2] : memref<128x128xf32, #tpu.memory_space<vmem>>, vector<128x128xf32>
    %cst = arith.constant dense<0.000000e+00> : vector<8x128xf32>
    %2 = tpu.matmul %0, %1, %cst {dimension_numbers = #tpu.dot_dimension_numbers<[1], [0], [0], [1], [0, 0, 1, 1], [], []>} : vector<8x128xf32>, vector<128x128xf32>, vector<8x128xf32> -> vector<8x128xf32>
    %c0_3 = arith.constant 0 : index
    %c0_4 = arith.constant 0 : index
    %3 = vector.load %arg3[%c0_3, %c0_4] : memref<1x128xf32, #tpu.memory_space<vmem>>, vector<1x128xf32>
    %4 = vector.broadcast %3 : vector<1x128xf32> to vector<8x128xf32>
    %5 = arith.addf %2, %4 : vector<8x128xf32>
    %c0_5 = arith.constant 0 : index
    %c0_6 = arith.constant 0 : index
    %6 = vector.load %arg4[%c0_5, %c0_6] : memref<128x128xf32, #tpu.memory_space<vmem>>, vector<128x128xf32>
    %cst_7 = arith.constant dense<0.000000e+00> : vector<8x128xf32>
    %7 = tpu.matmul %5, %6, %cst_7 {dimension_numbers = #tpu.dot_dimension_numbers<[1], [0], [0], [1], [0, 0, 1, 1], [], []>} : vector<8x128xf32>, vector<128x128xf32>, vector<8x128xf32> -> vector<8x128xf32>
    %c0_8 = arith.constant 0 : index
    %c0_9 = arith.constant 0 : index
    %8 = vector.load %arg5[%c0_8, %c0_9] : memref<1x128xf32, #tpu.memory_space<vmem>>, vector<1x128xf32>
    %9 = vector.broadcast %8 : vector<1x128xf32> to vector<8x128xf32>
    %10 = arith.addf %7, %9 : vector<8x128xf32>
    %cst_10 = arith.constant 0.000000e+00 : f32
    %11 = vector.broadcast %cst_10 : f32 to vector<8x128xf32>
    %12 = arith.maximumf %10, %11 : vector<8x128xf32>
    %c0_11 = arith.constant 0 : index
    %c0_12 = arith.constant 0 : index
    %13 = vector.load %arg6[%c0_11, %c0_12] : memref<128x128xf32, #tpu.memory_space<vmem>>, vector<128x128xf32>
    %cst_13 = arith.constant dense<0.000000e+00> : vector<8x128xf32>
    %14 = tpu.matmul %12, %13, %cst_13 {dimension_numbers = #tpu.dot_dimension_numbers<[1], [0], [0], [1], [0, 0, 1, 1], [], []>} : vector<8x128xf32>, vector<128x128xf32>, vector<8x128xf32> -> vector<8x128xf32>
    %c0_14 = arith.constant 0 : index
    %c0_15 = arith.constant 0 : index
    %15 = vector.load %arg7[%c0_14, %c0_15] : memref<1x128xf32, #tpu.memory_space<vmem>>, vector<1x128xf32>
    %16 = vector.broadcast %15 : vector<1x128xf32> to vector<8x128xf32>
    %17 = arith.addf %14, %16 : vector<8x128xf32>
    %c0_16 = arith.constant 0 : index
    %c0_17 = arith.constant 0 : index
    %18 = vector.load %arg8[%c0_16, %c0_17] : memref<8x128xf32, #tpu.memory_space<vmem>>, vector<8x128xf32>
    tpu.vector_store %arg8[%c0_16, %c0_17], %17 {strides = array<i32>} : memref<8x128xf32, #tpu.memory_space<vmem>>, vector<8x128xf32>,
    return
  }
  func.func @transform_0(%arg0: i32) -> (i32, i32) {
    %c0_i32 = arith.constant 0 : i32
    %c0_i32_0 = arith.constant 0 : i32
    return %arg0, %c0_i32 : i32, i32
  }
  func.func @transform_1(%arg0: i32) -> (i32, i32) {
    %c0_i32 = arith.constant 0 : i32
    %c0_i32_0 = arith.constant 0 : i32
    %c0_i32_1 = arith.constant 0 : i32
    return %c0_i32, %c0_i32_0 : i32, i32
  }
  func.func @transform_2(%arg0: i32) -> (i32, i32) {
    %c0_i32 = arith.constant 0 : i32
    %c0_i32_0 = arith.constant 0 : i32
    %c0_i32_1 = arith.constant 0 : i32
    return %c0_i32, %c0_i32_0 : i32, i32
  }
  func.func @transform_3(%arg0: i32) -> (i32, i32) {
    %c0_i32 = arith.constant 0 : i32
    %c0_i32_0 = arith.constant 0 : i32
    %c0_i32_1 = arith.constant 0 : i32
    return %c0_i32, %c0_i32_0 : i32, i32
  }
  func.func @transform_4(%arg0: i32) -> (i32, i32) {
    %c0_i32 = arith.constant 0 : i32
    %c0_i32_0 = arith.constant 0 : i32
    %c0_i32_1 = arith.constant 0 : i32
    return %c0_i32, %c0_i32_0 : i32, i32
  }
  func.func @transform_5(%arg0: i32) -> (i32, i32) {
    %c0_i32 = arith.constant 0 : i32
    %c0_i32_0 = arith.constant 0 : i32
    %c0_i32_1 = arith.constant 0 : i32
    return %c0_i32, %c0_i32_0 : i32, i32
  }
  func.func @transform_6(%arg0: i32) -> (i32, i32) {
    %c0_i32 = arith.constant 0 : i32
    %c0_i32_0 = arith.constant 0 : i32
    %c0_i32_1 = arith.constant 0 : i32
    return %c0_i32, %c0_i32_0 : i32, i32
  }
  func.func @transform_7(%arg0: i32) -> (i32, i32) {
    %c0_i32 = arith.constant 0 : i32
    %c0_i32_0 = arith.constant 0 : i32
    return %arg0, %c0_i32 : i32, i32
  }
}

</mosaic_0001>

<bundles_post_ra>
// kernel: tpu_custom_call.1
= control target key start
LH: loop header
LB: loop body
LE: loop exit
PB: predicated region body
PF: predicated region fallthrough
CT: control target
= control target key end

     0   :  { %12 = vsyncpa [#allocation3], 0  ;;  %s439_s0 = inlined_call_operand.hbm [shape: f32[8,128], index: 0, kind: input, shape index: {}]   ;;  %s440_s1 = inlined_call_operand.hbm [shape: f32[128,128], index: 1, kind: input, shape index: {}]   ;;  %s441_s2 = inlined_call_operand.vmem [shape: f32[1,128], index: 2, kind: input, shape index: {}]   ;;  %s442_s3 = inlined_call_operand.hbm [shape: f32[128,128], index: 3, kind: input, shape index: {}]   ;;  %s443_s4 = inlined_call_operand.vmem [shape: f32[1,128], index: 4, kind: input, shape index: {}]   ;;  %s444_s5 = inlined_call_operand.hbm [shape: f32[128,128], index: 5, kind: input, shape index: {}]   ;;  %s445_s6 = inlined_call_operand.vmem [shape: f32[1,128], index: 6, kind: input, shape index: {}]   ;;  %s446_s7 = inlined_call_operand.hbm [shape: f32[8,128], index: 7, kind: output, shape index: {}]  }
   0x1   :  { %13 = vsyncpa [#allocation6], 0 }
   0x2   :  { %14 = vsyncpa [#allocation9], 0  ;;  %s31_s26 = sshll.u32 %s440_s1, 4  ;;  %s32_s26 = int_to_ptr.hbm [resolvable:$true] %s31_s26 }
   0x3   :  { %15 = vsyncpa [#allocation4], 0  ;;  %s368_s27 = smov [#allocation5]   ;;  %s21_s8 = sshll.u32 %s439_s0, 4  ;;  %s22_s8 = int_to_ptr.hbm [resolvable:$true] %s21_s8 }
   0x4   :  { %s33_s28 = sshll.u32 %s368_s27, 4  ;;  %s369_s9 = smov 128   ;;  %s34_s28 = int_to_ptr.vmem [resolvable:$true] %s33_s28 }
   0x5   :  { %s370_s10 = smov 8   ;;  %s371_s11 = smov [#allocation2]  }
   0x6   :  { %39 = dma.hbm_to_vmem [thread:$0]  %s32_s26, 2048, %s34_s28, [#allocation6], %s369_s9, %s369_s9, %s370_s10  }
   0x7   :  { %s23_s12 = sshll.u32 %s371_s11, 4  ;;  %s46_s15 = sshll.u32 %s442_s3, 4  ;;  %s24_s12 = int_to_ptr.vmem [resolvable:$true] %s23_s12  ;;  %s47_s15 = int_to_ptr.hbm [resolvable:$true] %s46_s15 }
   0x8   :  { %26 = dma.hbm_to_vmem [thread:$0]  %s22_s8, 128, %s24_s12, [#allocation3]  }
   0x9   :  { %s61_s17 = sshll.u32 %s444_s5, 4  ;;  %s372_s18 = smov [#allocation7]   ;;  %s62_s17 = int_to_ptr.hbm [resolvable:$true] %s61_s17 }
   0xa   :  { %s48_s19 = sshll.u32 %s372_s18, 4  ;;  %s373_s0 = smov [#allocation8]   ;;  %s49_s19 = int_to_ptr.vmem [resolvable:$true] %s48_s19 }
   0xb   :  { %54 = dma.hbm_to_vmem [thread:$0]  %s47_s15, 2048, %s49_s19, [#allocation6], %s369_s9, %s369_s9, %s370_s10  }
   0xc   :  { %s63_s20 = sshll.u32 %s373_s0, 4  ;;  %s64_s20 = int_to_ptr.vmem [resolvable:$true] %s63_s20 }
   0xd   :  { %69 = dma.hbm_to_vmem [thread:$0]  %s62_s17, 2048, %s64_s20, [#allocation9], %s369_s9, %s369_s9, %s370_s10  }
   0xe   :  { %360 = dma.done.wait [#allocation3], 128  }
   0xf   :  { %361 = vsyncadd [#allocation3], 4294967168 }
  0x10   :  { %362 = dma.done.wait [#allocation6], 4096  }
  0x11   :  { %363 = vsyncadd [#allocation6], 4294963200 }
  0x12   :  { %364 = dma.done.wait [#allocation9], 2048  }
  0x13   :  { %365 = vsyncadd [#allocation9], 4294965248  ;;  %v104_v0 = vld [vmem:[#allocation5 + $0x78] sm:$0xff]  ;;  %v103_v1 = vld [vmem:[#allocation5 + $0x70] sm:$0xff]  ;;  %s218_s28 = sshll.u32 %s446_s7, 4  ;;  %s219_s28 = int_to_ptr.hbm [resolvable:$true] %s218_s28 }
  0x14   :  { %109 = vmatpush.msra.mxu0 %v104_v0  ;;  %v102_v2 = vld [vmem:[#allocation5 + $0x68] sm:$0xff]  ;;  %v101_v3 = vld [vmem:[#allocation5 + $0x60] sm:$0xff]  ;;  %v144_v4 = vld [vmem:[#allocation7 + $0x78] sm:$0xff] }
  0x15   :  { %v100_v5 = vld [vmem:[#allocation5 + $0x58] sm:$0xff]  ;;  %149 = vmatpush.msra.mxu1 %v144_v4  ;;  %v143_v6 = vld [vmem:[#allocation7 + $0x70] sm:$0xff]  ;;  %v142_v7 = vld [vmem:[#allocation7 + $0x68] sm:$0xff] }
  0x16   :  { %110 = vmatpush.msra.mxu0 %v103_v1  ;;  %v99_v8 = vld [vmem:[#allocation5 + $0x50] sm:$0xff]  ;;  %v141_v9 = vld [vmem:[#allocation7 + $0x60] sm:$0xff]  ;;  %v98_v10 = vld [vmem:[#allocation5 + $0x48] sm:$0xff] }
  0x17   :  { %150 = vmatpush.msra.mxu1 %v143_v6  ;;  %v140_v11 = vld [vmem:[#allocation7 + $0x58] sm:$0xff]  ;;  %v97_v12 = vld [vmem:[#allocation5 + $0x40] sm:$0xff]  ;;  %v139_v13 = vld [vmem:[#allocation7 + $0x50] sm:$0xff] }
  0x18   :  { %111 = vmatpush.msra.mxu0 %v102_v2  ;;  %v96_v14 = vld [vmem:[#allocation5 + $0x38] sm:$0xff]  ;;  %v138_v15 = vld [vmem:[#allocation7 + $0x48] sm:$0xff]  ;;  %v95_v16 = vld [vmem:[#allocation5 + $0x30] sm:$0xff] }
  0x19   :  { %151 = vmatpush.msra.mxu1 %v142_v7  ;;  %v137_v17 = vld [vmem:[#allocation7 + $0x40] sm:$0xff]  ;;  %v94_v18 = vld [vmem:[#allocation5 + $0x28] sm:$0xff]  ;;  %v136_v19 = vld [vmem:[#allocation7 + $0x38] sm:$0xff] }
  0x1a   :  { %112 = vmatpush.msra.mxu0 %v101_v3  ;;  %v93_v20 = vld [vmem:[#allocation5 + $0x20] sm:$0xff]  ;;  %v135_v21 = vld [vmem:[#allocation7 + $0x30] sm:$0xff]  ;;  %v92_v22 = vld [vmem:[#allocation5 + $0x18] sm:$0xff] }
  0x1b   :  { %152 = vmatpush.msra.mxu1 %v141_v9  ;;  %v134_v23 = vld [vmem:[#allocation7 + $0x28] sm:$0xff]  ;;  %v91_v24 = vld [vmem:[#allocation5 + $0x10] sm:$0xff]  ;;  %v133_v25 = vld [vmem:[#allocation7 + $0x20] sm:$0xff] }
  0x1c   :  { %113 = vmatpush.msra.mxu0 %v100_v5  ;;  %v90_v26 = vld [vmem:[#allocation5 + $0x8] sm:$0xff]  ;;  %v132_v27 = vld [vmem:[#allocation7 + $0x18] sm:$0xff]  ;;  %v89_v28 = vld [vmem:[#allocation5] sm:$0xff] }
  0x1d   :  { %153 = vmatpush.msra.mxu1 %v140_v11  ;;  %v88_v29 = vld [vmem:[#allocation2] sm:$0xff]  ;;  %v131_v30 = vld [vmem:[#allocation7 + $0x10] sm:$0xff]  ;;  %v130_v31 = vld [vmem:[#allocation7 + $0x8] sm:$0xff] }
  0x1e   :  { %114 = vmatpush.msra.mxu0 %v99_v8  ;;  %v129_v32 = vld [vmem:[#allocation7] sm:$0xff]  ;;  %v185_v33 = vld [vmem:[#allocation8 + $0x78] sm:$0xff]  ;;  %v184_v34 = vld [vmem:[#allocation8 + $0x70] sm:$0xff] }
  0x1f   :  { %154 = vmatpush.msra.mxu1 %v139_v13  ;;  %190 = vmatpush.msra.mxu2 %v185_v33  ;;  %v183_v35 = vld [vmem:[#allocation8 + $0x68] sm:$0xff]  ;;  %v182_v36 = vld [vmem:[#allocation8 + $0x60] sm:$0xff]  ;;  %v181_v37 = vld [vmem:[#allocation8 + $0x58] sm:$0xff] }
  0x20   :  { %115 = vmatpush.msra.mxu0 %v98_v10  ;;  %v180_v38 = vld [vmem:[#allocation8 + $0x50] sm:$0xff]  ;;  %v179_v39 = vld [vmem:[#allocation8 + $0x48] sm:$0xff]  ;;  %v178_v40 = vld [vmem:[#allocation8 + $0x40] sm:$0xff] }
  0x21   :  { %155 = vmatpush.msra.mxu1 %v138_v15  ;;  %191 = vmatpush.msra.mxu2 %v184_v34  ;;  %v177_v41 = vld [vmem:[#allocation8 + $0x38] sm:$0xff]  ;;  %v176_v42 = vld [vmem:[#allocation8 + $0x30] sm:$0xff]  ;;  %v175_v43 = vld [vmem:[#allocation8 + $0x28] sm:$0xff] }
  0x22   :  { %116 = vmatpush.msra.mxu0 %v97_v12  ;;  %v174_v44 = vld [vmem:[#allocation8 + $0x20] sm:$0xff]  ;;  %v173_v45 = vld [vmem:[#allocation8 + $0x18] sm:$0xff]  ;;  %v172_v49 = vld [vmem:[#allocation8 + $0x10] sm:$0xff] }
  0x23   :  { %156 = vmatpush.msra.mxu1 %v137_v17  ;;  %192 = vmatpush.msra.mxu2 %v183_v35  ;;  %v237_v46 = vld [vmem:[%s441_s2] ss:$0 sm:$0xff]  ;;  %v171_v50 = vld [vmem:[#allocation8 + $0x8] sm:$0xff]  ;;  %v170_v51 = vld [vmem:[#allocation8] sm:$0xff]  ;;  %s374_s2 = smov [#allocation10]  }
  0x24   :  { %117 = vmatpush.msra.mxu0 %v96_v14  ;;  %v238_v52 = vld [vmem:[%s443_s4] ss:$0 sm:$0xff]  ;;  %s216_s25 = sshll.u32 %s374_s2, 4  ;;  %s217_s25 = int_to_ptr.vmem [resolvable:$true] %s216_s25 }
  0x25   :  { %157 = vmatpush.msra.mxu1 %v136_v19  ;;  %193 = vmatpush.msra.mxu2 %v182_v36  ;;  %v239_v56 = vld [vmem:[%s445_s6] ss:$0 sm:$0xff] }
  0x26   :  { %118 = vmatpush.msra.mxu0 %v95_v16 }
  0x27   :  { %158 = vmatpush.msra.mxu1 %v135_v21  ;;  %194 = vmatpush.msra.mxu2 %v181_v37 }
  0x28   :  { %119 = vmatpush.msra.mxu0 %v94_v18 }
  0x29   :  { %159 = vmatpush.msra.mxu1 %v134_v23  ;;  %195 = vmatpush.msra.mxu2 %v180_v38 }
  0x2a   :  { %120 = vmatpush.msra.mxu0 %v93_v20 }
  0x2b   :  { %160 = vmatpush.msra.mxu1 %v133_v25  ;;  %196 = vmatpush.msra.mxu2 %v179_v39 }
  0x2c   :  { %121 = vmatpush.msra.mxu0 %v92_v22 }
  0x2d   :  { %161 = vmatpush.msra.mxu1 %v132_v27  ;;  %197 = vmatpush.msra.mxu2 %v178_v40 }
  0x2e   :  { %122 = vmatpush.msra.mxu0 %v91_v24 }
  0x2f   :  { %162 = vmatpush.msra.mxu1 %v131_v30  ;;  %198 = vmatpush.msra.mxu2 %v177_v41 }
  0x30   :  { %123 = vmatpush.msra.mxu0 %v90_v26 }
  0x31   :  { %163 = vmatpush.msra.mxu1 %v130_v31  ;;  %199 = vmatpush.msra.mxu2 %v176_v42 }
  0x32   :  { %124 = vmatpush.msra.mxu0 %v89_v28 }
  0x33   :  { %125 = vmatmul.f32.vlgmr.msra.gmra.mxu0 %v88_v29  ;;  %164 = vmatpush.msra.mxu1 %v129_v32 }
  0x34   :  { %200 = vmatpush.msra.mxu2 %v175_v43 }
  0x36   :  { %201 = vmatpush.msra.mxu2 %v174_v44 }
  0x38   :  { %202 = vmatpush.msra.mxu2 %v173_v45 }
  0x3a   :  { %203 = vmatpush.msra.mxu2 %v172_v49 }
  0x3c   :  { %204 = vmatpush.msra.mxu2 %v171_v50 }
  0x3e   :  { %205 = vmatpush.msra.mxu2 %v170_v51 }
  0xb0   :  { %v126_v47 = vpop.f32.mrf.mxu0 }
  0xb1   :  { %v127_v48 = vadd.f32 %v237_v46, %v126_v47 }
  0xb3   :  { %165 = vmatmul.f32.vlgmr.msra.gmra.mxu1 %v127_v48 }
 0x130   :  { %v166_v53 = vpop.f32.mrf.mxu1 }
 0x131   :  { %v167_v54 = vadd.f32 %v238_v52, %v166_v53 }
 0x133   :  { %v169_v55 = vmax.f32 %v167_v54, 0.0 }
 0x135   :  { %206 = vmatmul.f32.vlgmr.msra.gmra.mxu2 %v169_v55 }
 0x1b8   :  { %v207_v57 = vpop.f32.mrf.mxu2 }
 0x1b9   :  { %v208_v58 = vadd.f32 %v239_v56, %v207_v57 }
 0x1bb   :  { %210 = vst [vmem:[#allocation10] sm:$0xff] %v208_v58 }
 0x1bc   :  { %221 = dma.vmem_to_hbm [thread:$0]  %s217_s25, 128, %s219_s28, [#allocation4]  }
 0x1bd   :  { %366 = dma.done.wait [#allocation4], 128  }
 0x1be   :  { %367 = vsyncadd [#allocation4], 4294967168 }
 0x1bf   :  { %226 = vsyncpa [#allocation3], 1 }
 0x1c0   :  { %227 = vsyncpa [#allocation6], 1 }
 0x1c1   :  { %228 = vsyncpa [#allocation9], 1 }
 0x1c2   :  { %229 = vsyncpa [#allocation4], 1 }

</bundles_post_ra>
